<compile_context>
chip_gen: v7x
topology: tpu7x:2x2x1
jax: 0.10.0
libtpu: 0.0.40
codegen_flags: <defaults>
</compile_context>

<pallas_src>
import functools

import jax
import jax.numpy as jnp
from jax import lax
from jax.experimental import pallas as pl
from jax.experimental.pallas import tpu as pltpu

_LANE = 128
_SUBLANE = 8

# Flipped to False (and cached) if this JAX build rejects pl.Buffered(1)
# grid pipelining for resident weights.
_WEIGHT_SINGLE_BUFFER = [True]


def _round_up(x, m):
    return (x + m - 1) // m * m


def _cdiv(a, b):
    return -(-a // b)


def _vmem_limit_bytes():
    """Generation-aware scoped-VMEM budget (v7x only has 64 MiB physical)."""
    try:
        cap = int(pltpu.get_tpu_info().vmem_capacity_bytes)
        budget = cap * 3 // 4                      # ~48 MiB v7x, capped below
    except Exception:                              # query unavailable -> proven default
        return 32 * 1024 * 1024
    return max(32 * 1024 * 1024, min(budget, 64 * 1024 * 1024))


def _block_diag(w, p):
    """(..., a, b) -> (..., p*a, p*b): p copies of w on the block diagonal."""
    if p == 1:
        return w
    a, b = w.shape[-2], w.shape[-1]
    eye = jnp.eye(p, dtype=w.dtype)
    out = jnp.einsum("pq,...ab->...paqb", eye, w)
    return out.reshape(*w.shape[:-2], p * a, p * b)


def _fcn_kernel(x_ref, w_in_ref, b_in_ref, *refs, n_hidden_layers, matmul_dtype):
    """Full MLP forward for one (lane-packed) batch block, resident in VMEM.

    x_ref     : (TBP, CIN)              CIN  = pack * N_INPUT
    w_in_ref  : (CIN, W)                W    = pack * N_HIDDEN (block-diagonal)
    b_in_ref  : (1, W)                  f32
    w_h_ref   : (L, W, W)               block-diagonal   (only if L > 0)
    b_h_ref   : (L, 1, W)               f32              (only if L > 0)
    w_out_ref : (W, COUT)               COUT = pack * N_OUTPUT (block-diagonal)
    b_out_ref : (1, COUT)               f32
    o_ref     : (TBP, COUT)
    """
    if n_hidden_layers > 0:
        w_h_ref, b_h_ref, w_out_ref, b_out_ref, o_ref = refs
    else:
        w_out_ref, b_out_ref, o_ref = refs

    x = x_ref[...]
    tb = x.shape[0]
    cin = x.shape[1]
    width = w_in_ref.shape[1]

    # --- fcs: Linear + Tanh -------------------------------------------------
    # PINN inputs have a tiny contraction depth; an MXU push would be dominated
    # by fill/drain, so use broadcast FMAs on the VPU. Weight rows and the bias
    # broadcast are hoisted out of the loop (loaded/cast once, f32).
    if cin <= 8:
        w_in = w_in_ref[...].astype(jnp.float32)
        acc = jnp.broadcast_to(b_in_ref[...], (tb, width))
        for i in range(cin):
            acc = acc + x[:, i:i + 1] * w_in[i:i + 1, :]
        h = jnp.tanh(acc)
    else:
        h = jnp.tanh(
            jnp.dot(x.astype(matmul_dtype), w_in_ref[...],
                    preferred_element_type=jnp.float32) + b_in_ref[...])

    # --- fch: (N_LAYERS - 1) x (Linear + Tanh) ------------------------------
    def layer(hh, w, b):
        return jnp.tanh(
            jnp.dot(hh.astype(matmul_dtype), w,
                    preferred_element_type=jnp.float32) + b)

    if n_hidden_layers > 0:
        if n_hidden_layers < 8:
            for i in range(n_hidden_layers):
                h = layer(h, w_h_ref[i], b_h_ref[i])
        else:
            # Deep stacks: keep vreg live ranges tight.
            h = lax.fori_loop(
                0, n_hidden_layers,
                lambda i, hh: layer(hh, w_h_ref[i], b_h_ref[i]),
                h, unroll=True)

    # --- fce: Linear (slim output; small-N store is far cheaper than the
    #     128-lane-padded HBM writeback it replaces) -------------------------
    o_ref[...] = (
        jnp.dot(h.astype(matmul_dtype), w_out_ref[...],
                preferred_element_type=jnp.float32)
        + b_out_ref[...]).astype(o_ref.dtype)


def prepare_fcn_params(params, *, matmul_dtype=jnp.float32):
    """One-time layout preparation (hoisted out of the per-call path).

    * Transposes PyTorch-convention (out, in) weights to (in, out).
    * Builds block-diagonal copies so `pack = 128 // N_HIDDEN` batch rows share
      each vreg's lanes (only when N_HIDDEN divides 128 and is < 128).
    * Pre-casts weights to `matmul_dtype`; biases stay f32.
    """
    fcs_w = jnp.asarray(params["fcs_w"], jnp.float32)     # (H, N_in)
    fcs_b = jnp.asarray(params["fcs_b"], jnp.float32)     # (H,)
    fch_w = jnp.asarray(params["fch_w"], jnp.float32)     # (L-1, H, H)
    fch_b = jnp.asarray(params["fch_b"], jnp.float32)     # (L-1, H)
    fce_w = jnp.asarray(params["fce_w"], jnp.float32)     # (N_out, H)
    fce_b = jnp.asarray(params["fce_b"], jnp.float32)     # (N_out,)

    n_hidden, n_input = fcs_w.shape
    n_out = fce_w.shape[0]
    n_hidden_layers = int(fch_w.shape[0])

    pack = _LANE // n_hidden if (n_hidden < _LANE and _LANE % n_hidden == 0) else 1

    prep = {
        "w_in": _block_diag(fcs_w.T, pack).astype(matmul_dtype),   # (P*Nin, P*H)
        "b_in": jnp.tile(fcs_b, pack)[None, :],                    # (1, P*H) f32
        "w_out": _block_diag(fce_w.T, pack).astype(matmul_dtype),  # (P*H, P*Nout)
        "b_out": jnp.tile(fce_b, pack)[None, :],                   # (1, P*Nout) f32
        "w_h": None, "b_h": None,
        "pack": pack, "n_input": int(n_input), "n_out": int(n_out),
        "n_hidden_layers": n_hidden_layers, "matmul_dtype": matmul_dtype,
    }
    if n_hidden_layers > 0:
        prep["w_h"] = _block_diag(
            jnp.transpose(fch_w, (0, 2, 1)), pack).astype(matmul_dtype)  # (L, P*H, P*H)
        prep["b_h"] = jnp.tile(fch_b, (1, pack))[:, None, :]             # (L, 1, P*H) f32
    return prep


def fcn_forward_prepared(x, prep, *, block_batch=2048):
    """Forward pass using pre-prepared params.

    The grid iterates over lane-packed batch blocks; weights/biases use
    constant index maps (requested single-buffered) so they stay resident in
    VMEM across grid steps.
    """
    batch, n_input = x.shape
    if n_input != prep["n_input"]:
        raise ValueError(f"expected {prep['n_input']} input features, got {n_input}")

    pack = prep["pack"]
    n_out = prep["n_out"]
    n_hidden_layers = prep["n_hidden_layers"]
    matmul_dtype = prep["matmul_dtype"]

    w_in, b_in = prep["w_in"], prep["b_in"]
    w_out, b_out = prep["w_out"], prep["b_out"]
    cin = w_in.shape[0]        # pack * n_input
    width = w_in.shape[1]      # pack * n_hidden
    cout = w_out.shape[1]      # pack * n_out

    # --- pack `pack` consecutive batch rows along lanes (row-major reshape) --
    rows = _cdiv(batch, pack)
    if rows * pack != batch:
        x = jnp.pad(x, ((0, rows * pack - batch), (0, 0)))
    xp = x.reshape(rows, cin)

    # --- size the packed-row block against a generation-aware VMEM budget ----
    vmem_limit = _vmem_limit_bytes()
    itemsize = jnp.dtype(matmul_dtype).itemsize
    weight_bytes = ((w_in.size + w_out.size) * itemsize
                    + (b_in.size + b_out.size) * 4)
    if n_hidden_layers > 0:
        weight_bytes += prep["w_h"].size * itemsize + prep["b_h"].size * 4
    # double-buffered x/out tiles + ~4 live f32 activation rows per packed row;
    # assume worst-case double-buffered weights for the budget check.
    row_bytes = 4 * (2 * cin + 2 * cout + 4 * width)
    tbp_cap = max(_SUBLANE,
                  ((vmem_limit - 2 * weight_bytes) // max(row_bytes, 1))
                  // _SUBLANE * _SUBLANE)

    tbp = _round_up(max(block_batch // pack, _SUBLANE), _SUBLANE)
    tbp = min(tbp, _round_up(rows, _SUBLANE))
    if rows >= 2 * _SUBLANE:                      # keep >=2 blocks (v7x dual-TC)
        tbp = min(tbp, _round_up(_cdiv(rows, 2), _SUBLANE))
    tbp = max(_SUBLANE, min(tbp, tbp_cap))

    rows_pad = _round_up(rows, tbp)
    if rows_pad != rows:
        xp = jnp.pad(xp, ((0, rows_pad - rows), (0, 0)))
    n_blocks = rows_pad // tbp

    kernel = functools.partial(_fcn_kernel,
                               n_hidden_layers=n_hidden_layers,
                               matmul_dtype=matmul_dtype)

    flops = 2.0 * rows_pad * (cin * width
                              + n_hidden_layers * width * width
                              + width * cout)
    transcendentals = float(rows_pad) * width * (n_hidden_layers + 1)
    bytes_accessed = 4.0 * (xp.size + rows_pad * cout) + float(weight_bytes)
    cost = pl.CostEstimate(flops=int(flops),
                           transcendentals=int(transcendentals),
                           bytes_accessed=int(bytes_accessed))

    def weight_spec(shape, single_buffer):
        ndim = len(shape)

        def idx(i):
            return (0,) * ndim

        if single_buffer:
            # Constant index map -> never re-fetched; a single buffer halves
            # resident weight VMEM (matters for large H on v7x's 64 MiB).
            return pl.BlockSpec(shape, idx, pipeline_mode=pl.Buffered(1))
        return pl.BlockSpec(shape, idx)

    def run(single_buffer):
        in_specs = [pl.BlockSpec((tbp, cin), lambda i: (i, 0)),
                    weight_spec(w_in.shape, single_buffer),
                    weight_spec(b_in.shape, single_buffer)]
        args = [xp, w_in, b_in]
        if n_hidden_layers > 0:
            in_specs += [weight_spec(prep["w_h"].shape, single_buffer),
                         weight_spec(prep["b_h"].shape, single_buffer)]
            args += [prep["w_h"], prep["b_h"]]
        in_specs += [weight_spec(w_out.shape, single_buffer),
                     weight_spec(b_out.shape, single_buffer)]
        args += [w_out, b_out]

        return pl.pallas_call(
            kernel,
            out_shape=jax.ShapeDtypeStruct((rows_pad, cout), x.dtype),
            grid=(n_blocks,),
            in_specs=in_specs,
            out_specs=pl.BlockSpec((tbp, cout), lambda i: (i, 0)),
            compiler_params=pltpu.CompilerParams(
                dimension_semantics=("parallel",),
                vmem_limit_bytes=int(vmem_limit)),
            cost_estimate=cost,
        )(*args)

    if _WEIGHT_SINGLE_BUFFER[0]:
        try:
            out = run(True)
        except Exception:
            # This JAX build rejected pl.Buffered(1) grid pipelining; fall back
            # to default (double-buffered) resident weights and remember it.
            _WEIGHT_SINGLE_BUFFER[0] = False
            out = run(False)
    else:
        out = run(False)

    # Un-pack lanes back into batch rows and strip padding.
    return out.reshape(rows_pad * pack, n_out)[:batch]


def fcn_forward(x, params, *, block_batch=2048, matmul_dtype=jnp.float32):
    """Convenience wrapper: PyTorch-convention params -> forward pass."""
    prep = prepare_fcn_params(params, matmul_dtype=matmul_dtype)
    return fcn_forward_prepared(x, prep, block_batch=block_batch)


def init_fcn_params(key, n_input, n_output, n_hidden, n_layers):
    """Deterministic init mimicking PyTorch nn.Linear default U[-1/sqrt(in), 1/sqrt(in)]."""
    keys = jax.random.split(key, 6)

    def uni(k, shape, fan_in):
        bound = 1.0 / jnp.sqrt(jnp.float32(fan_in))
        return jax.random.uniform(k, shape, jnp.float32, -bound, bound)

    return {
        "fcs_w": uni(keys[0], (n_hidden, n_input), n_input),
        "fcs_b": uni(keys[1], (n_hidden,), n_input),
        "fch_w": uni(keys[2], (n_layers - 1, n_hidden, n_hidden), n_hidden),
        "fch_b": uni(keys[3], (n_layers - 1, n_hidden), n_hidden),
        "fce_w": uni(keys[4], (n_output, n_hidden), n_hidden),
        "fce_b": uni(keys[5], (n_output,), n_hidden),
    }


def fcn_reference(x, params):
    """Pure-JAX reference replicating the PyTorch forward."""
    h = jnp.tanh(x @ params["fcs_w"].T + params["fcs_b"])
    for i in range(params["fch_w"].shape[0]):
        h = jnp.tanh(h @ params["fch_w"][i].T + params["fch_b"][i])
    return h @ params["fce_w"].T + params["fce_b"]


if __name__ == "__main__":
    key = jax.random.PRNGKey(0)
    k_x, k_p, k_x2, k_p2, k_x3, k_p3 = jax.random.split(key, 6)

    # --- Test 1: PINN sizes (H=32 -> lane-packing factor 4), single block ---
    N_INPUT, N_OUTPUT, N_HIDDEN, N_LAYERS = 2, 1, 32, 3
    BATCH = 16
    x = jax.random.normal(k_x, (BATCH, N_INPUT), dtype=jnp.float32)
    params = init_fcn_params(k_p, N_INPUT, N_OUTPUT, N_HIDDEN, N_LAYERS)

    prep = prepare_fcn_params(params)              # one-time layout prep
    out = jax.block_until_ready(fcn_forward_prepared(x, prep))
    ref = fcn_reference(x, params)
    assert out.shape == (BATCH, N_OUTPUT), out.shape
    assert jnp.allclose(out, ref, atol=1e-5, rtol=1e-5)

    # --- Test 2: multi-block grid, batch not a multiple of the block --------
    BATCH2 = 300
    x2 = jax.random.normal(k_x2, (BATCH2, N_INPUT), dtype=jnp.float32)
    out2 = jax.block_until_ready(
        fcn_forward_prepared(x2, prep, block_batch=128))
    ref2 = fcn_reference(x2, params)
    assert out2.shape == (BATCH2, N_OUTPUT), out2.shape
    assert jnp.allclose(out2, ref2, atol=1e-5, rtol=1e-5)

    # --- Test 3: N_LAYERS = 1 (zero hidden layers, operands dropped) --------
    params1 = init_fcn_params(k_p2, N_INPUT, N_OUTPUT, N_HIDDEN, 1)
    out3 = jax.block_until_ready(fcn_forward(x, params1))
    ref3 = fcn_reference(x, params1)
    assert out3.shape == (BATCH, N_OUTPUT), out3.shape
    assert jnp.allclose(out3, ref3, atol=1e-5, rtol=1e-5)

    # --- Test 4: hidden width not dividing 128 (pack = 1 fallback path) -----
    BATCH3 = 40
    params48 = init_fcn_params(k_p3, N_INPUT, N_OUTPUT, 48, 2)
    x3 = jax.random.normal(k_x3, (BATCH3, N_INPUT), dtype=jnp.float32)
    out4 = jax.block_until_ready(fcn_forward(x3, params48))
    ref4 = fcn_reference(x3, params48)
    assert out4.shape == (BATCH3, N_OUTPUT), out4.shape
    assert jnp.allclose(out4, ref4, atol=1e-5, rtol=1e-5)

    print("KERNEL_OK")
</pallas_src>

<mosaic_0001>
module attributes {stable_mosaic.version = 11 : i64} {
  func.func @_fcn_kernel(%arg0: i32, %arg1: memref<8x8xf32, #tpu.memory_space<vmem>>, %arg2: memref<8x128xf32, #tpu.memory_space<vmem>>, %arg3: memref<1x128xf32, #tpu.memory_space<vmem>>, %arg4: memref<2x128x128xf32, #tpu.memory_space<vmem>>, %arg5: memref<2x1x128xf32, #tpu.memory_space<vmem>>, %arg6: memref<128x4xf32, #tpu.memory_space<vmem>>, %arg7: memref<1x4xf32, #tpu.memory_space<vmem>>, %arg8: memref<8x4xf32, #tpu.memory_space<vmem>>) attributes {dimension_semantics = [#tpu.dimension_semantics<parallel>], iteration_bounds = array<i64: 1>, scalar_prefetch = 0 : i64, scratch_operands = 0 : i64, tpu.core_type = #tpu.core_type<tc>, window_params = [{transform_indices = @transform_0, window_bounds = array<i64: 8, 8>}, {pipeline_mode = #tpu.pipeline_mode<synchronous>, transform_indices = @transform_1, window_bounds = array<i64: 8, 128>}, {pipeline_mode = #tpu.pipeline_mode<synchronous>, transform_indices = @transform_2, window_bounds = array<i64: 1, 128>}, {pipeline_mode = #tpu.pipeline_mode<synchronous>, transform_indices = @transform_3, window_bounds = array<i64: 2, 128, 128>}, {pipeline_mode = #tpu.pipeline_mode<synchronous>, transform_indices = @transform_4, window_bounds = array<i64: 2, 1, 128>}, {pipeline_mode = #tpu.pipeline_mode<synchronous>, transform_indices = @transform_5, window_bounds = array<i64: 128, 4>}, {pipeline_mode = #tpu.pipeline_mode<synchronous>, transform_indices = @transform_6, window_bounds = array<i64: 1, 4>}, {transform_indices = @transform_7, window_bounds = array<i64: 8, 4>}]} {
    %c0 = arith.constant 0 : index
    %c0_0 = arith.constant 0 : index
    %0 = vector.load %arg1[%c0, %c0_0] : memref<8x8xf32, #tpu.memory_space<vmem>>, vector<8x8xf32>
    %c0_1 = arith.constant 0 : index
    %c0_2 = arith.constant 0 : index
    %1 = vector.load %arg2[%c0_1, %c0_2] : memref<8x128xf32, #tpu.memory_space<vmem>>, vector<8x128xf32>
    %c0_3 = arith.constant 0 : index
    %c0_4 = arith.constant 0 : index
    %2 = vector.load %arg3[%c0_3, %c0_4] : memref<1x128xf32, #tpu.memory_space<vmem>>, vector<1x128xf32>
    %3 = vector.shape_cast %2 : vector<1x128xf32> to vector<1x128xf32>
    %4 = vector.broadcast %3 : vector<1x128xf32> to vector<8x128xf32>
    %5 = vector.extract_strided_slice %0 {offsets = [0, 0], sizes = [8, 1], strides = [1, 1]} : vector<8x8xf32> to vector<8x1xf32>
    %6 = vector.extract_strided_slice %1 {offsets = [0, 0], sizes = [1, 128], strides = [1, 1]} : vector<8x128xf32> to vector<1x128xf32>
    %7 = vector.broadcast %5 : vector<8x1xf32> to vector<8x128xf32>
    %8 = vector.broadcast %6 : vector<1x128xf32> to vector<8x128xf32>
    %9 = arith.mulf %7, %8 : vector<8x128xf32>
    %10 = arith.addf %4, %9 : vector<8x128xf32>
    %11 = vector.extract_strided_slice %0 {offsets = [0, 1], sizes = [8, 1], strides = [1, 1]} : vector<8x8xf32> to vector<8x1xf32>
    %12 = vector.extract_strided_slice %1 {offsets = [1, 0], sizes = [1, 128], strides = [1, 1]} : vector<8x128xf32> to vector<1x128xf32>
    %13 = vector.broadcast %11 : vector<8x1xf32> to vector<8x128xf32>
    %14 = vector.broadcast %12 : vector<1x128xf32> to vector<8x128xf32>
    %15 = arith.mulf %13, %14 : vector<8x128xf32>
    %16 = arith.addf %10, %15 : vector<8x128xf32>
    %17 = vector.extract_strided_slice %0 {offsets = [0, 2], sizes = [8, 1], strides = [1, 1]} : vector<8x8xf32> to vector<8x1xf32>
    %18 = vector.extract_strided_slice %1 {offsets = [2, 0], sizes = [1, 128], strides = [1, 1]} : vector<8x128xf32> to vector<1x128xf32>
    %19 = vector.broadcast %17 : vector<8x1xf32> to vector<8x128xf32>
    %20 = vector.broadcast %18 : vector<1x128xf32> to vector<8x128xf32>
    %21 = arith.mulf %19, %20 : vector<8x128xf32>
    %22 = arith.addf %16, %21 : vector<8x128xf32>
    %23 = vector.extract_strided_slice %0 {offsets = [0, 3], sizes = [8, 1], strides = [1, 1]} : vector<8x8xf32> to vector<8x1xf32>
    %24 = vector.extract_strided_slice %1 {offsets = [3, 0], sizes = [1, 128], strides = [1, 1]} : vector<8x128xf32> to vector<1x128xf32>
    %25 = vector.broadcast %23 : vector<8x1xf32> to vector<8x128xf32>
    %26 = vector.broadcast %24 : vector<1x128xf32> to vector<8x128xf32>
    %27 = arith.mulf %25, %26 : vector<8x128xf32>
    %28 = arith.addf %22, %27 : vector<8x128xf32>
    %29 = vector.extract_strided_slice %0 {offsets = [0, 4], sizes = [8, 1], strides = [1, 1]} : vector<8x8xf32> to vector<8x1xf32>
    %30 = vector.extract_strided_slice %1 {offsets = [4, 0], sizes = [1, 128], strides = [1, 1]} : vector<8x128xf32> to vector<1x128xf32>
    %31 = vector.broadcast %29 : vector<8x1xf32> to vector<8x128xf32>
    %32 = vector.broadcast %30 : vector<1x128xf32> to vector<8x128xf32>
    %33 = arith.mulf %31, %32 : vector<8x128xf32>
    %34 = arith.addf %28, %33 : vector<8x128xf32>
    %35 = vector.extract_strided_slice %0 {offsets = [0, 5], sizes = [8, 1], strides = [1, 1]} : vector<8x8xf32> to vector<8x1xf32>
    %36 = vector.extract_strided_slice %1 {offsets = [5, 0], sizes = [1, 128], strides = [1, 1]} : vector<8x128xf32> to vector<1x128xf32>
    %37 = vector.broadcast %35 : vector<8x1xf32> to vector<8x128xf32>
    %38 = vector.broadcast %36 : vector<1x128xf32> to vector<8x128xf32>
    %39 = arith.mulf %37, %38 : vector<8x128xf32>
    %40 = arith.addf %34, %39 : vector<8x128xf32>
    %41 = vector.extract_strided_slice %0 {offsets = [0, 6], sizes = [8, 1], strides = [1, 1]} : vector<8x8xf32> to vector<8x1xf32>
    %42 = vector.extract_strided_slice %1 {offsets = [6, 0], sizes = [1, 128], strides = [1, 1]} : vector<8x128xf32> to vector<1x128xf32>
    %43 = vector.broadcast %41 : vector<8x1xf32> to vector<8x128xf32>
    %44 = vector.broadcast %42 : vector<1x128xf32> to vector<8x128xf32>
    %45 = arith.mulf %43, %44 : vector<8x128xf32>
    %46 = arith.addf %40, %45 : vector<8x128xf32>
    %47 = vector.extract_strided_slice %0 {offsets = [0, 7], sizes = [8, 1], strides = [1, 1]} : vector<8x8xf32> to vector<8x1xf32>
    %48 = vector.extract_strided_slice %1 {offsets = [7, 0], sizes = [1, 128], strides = [1, 1]} : vector<8x128xf32> to vector<1x128xf32>
    %49 = vector.broadcast %47 : vector<8x1xf32> to vector<8x128xf32>
    %50 = vector.broadcast %48 : vector<1x128xf32> to vector<8x128xf32>
    %51 = arith.mulf %49, %50 : vector<8x128xf32>
    %52 = arith.addf %46, %51 : vector<8x128xf32>
    %53 = math.tanh %52 : vector<8x128xf32>
    %c0_5 = arith.constant 0 : index
    %c0_6 = arith.constant 0 : index
    %c0_7 = arith.constant 0 : index
    %54 = vector.load %arg4[%c0_5, %c0_6, %c0_7] : memref<2x128x128xf32, #tpu.memory_space<vmem>>, vector<1x128x128xf32>
    %55 = vector.shape_cast %54 : vector<1x128x128xf32> to vector<128x128xf32>
    %c0_8 = arith.constant 0 : index
    %c0_9 = arith.constant 0 : index
    %c0_10 = arith.constant 0 : index
    %56 = vector.load %arg5[%c0_8, %c0_9, %c0_10] : memref<2x1x128xf32, #tpu.memory_space<vmem>>, vector<1x1x128xf32>
    %57 = vector.shape_cast %56 : vector<1x1x128xf32> to vector<1x128xf32>
    %cst = arith.constant dense<0.000000e+00> : vector<8x128xf32>
    %58 = tpu.matmul %53, %55, %cst {dimension_numbers = #tpu.dot_dimension_numbers<[1], [0], [0], [1], [0, 0, 1, 1], [], []>} : vector<8x128xf32>, vector<128x128xf32>, vector<8x128xf32> -> vector<8x128xf32>
    %59 = vector.broadcast %57 : vector<1x128xf32> to vector<8x128xf32>
    %60 = arith.addf %58, %59 : vector<8x128xf32>
    %61 = math.tanh %60 : vector<8x128xf32>
    %c1 = arith.constant 1 : index
    %c0_11 = arith.constant 0 : index
    %c0_12 = arith.constant 0 : index
    %62 = vector.load %arg4[%c1, %c0_11, %c0_12] : memref<2x128x128xf32, #tpu.memory_space<vmem>>, vector<1x128x128xf32>
    %63 = vector.shape_cast %62 : vector<1x128x128xf32> to vector<128x128xf32>
    %c1_13 = arith.constant 1 : index
    %c0_14 = arith.constant 0 : index
    %c0_15 = arith.constant 0 : index
    %64 = vector.load %arg5[%c1_13, %c0_14, %c0_15] : memref<2x1x128xf32, #tpu.memory_space<vmem>>, vector<1x1x128xf32>
    %65 = vector.shape_cast %64 : vector<1x1x128xf32> to vector<1x128xf32>
    %cst_16 = arith.constant dense<0.000000e+00> : vector<8x128xf32>
    %66 = tpu.matmul %61, %63, %cst_16 {dimension_numbers = #tpu.dot_dimension_numbers<[1], [0], [0], [1], [0, 0, 1, 1], [], []>} : vector<8x128xf32>, vector<128x128xf32>, vector<8x128xf32> -> vector<8x128xf32>
    %67 = vector.broadcast %65 : vector<1x128xf32> to vector<8x128xf32>
    %68 = arith.addf %66, %67 : vector<8x128xf32>
    %69 = math.tanh %68 : vector<8x128xf32>
    %c0_17 = arith.constant 0 : index
    %c0_18 = arith.constant 0 : index
    %70 = vector.load %arg6[%c0_17, %c0_18] : memref<128x4xf32, #tpu.memory_space<vmem>>, vector<128x4xf32>
    %cst_19 = arith.constant dense<0.000000e+00> : vector<8x4xf32>
    %71 = tpu.matmul %69, %70, %cst_19 {dimension_numbers = #tpu.dot_dimension_numbers<[1], [0], [0], [1], [0, 0, 1, 1], [], []>} : vector<8x128xf32>, vector<128x4xf32>, vector<8x4xf32> -> vector<8x4xf32>
    %c0_20 = arith.constant 0 : index
    %c0_21 = arith.constant 0 : index
    %72 = vector.load %arg7[%c0_20, %c0_21] : memref<1x4xf32, #tpu.memory_space<vmem>>, vector<1x4xf32>
    %73 = vector.broadcast %72 : vector<1x4xf32> to vector<8x4xf32>
    %74 = arith.addf %71, %73 : vector<8x4xf32>
    %c0_22 = arith.constant 0 : index
    %c0_23 = arith.constant 0 : index
    %75 = vector.load %arg8[%c0_22, %c0_23] : memref<8x4xf32, #tpu.memory_space<vmem>>, vector<8x4xf32>
    tpu.vector_store %arg8[%c0_22, %c0_23], %74 {strides = array<i32>} : memref<8x4xf32, #tpu.memory_space<vmem>>, vector<8x4xf32>,
    return
  }
  func.func @transform_0(%arg0: i32) -> (i32, i32) {
    %c0_i32 = arith.constant 0 : i32
    %c0_i32_0 = arith.constant 0 : i32
    return %arg0, %c0_i32 : i32, i32
  }
  func.func @transform_1(%arg0: i32) -> (i32, i32) {
    %c0_i32 = arith.constant 0 : i32
    %c0_i32_0 = arith.constant 0 : i32
    %c0_i32_1 = arith.constant 0 : i32
    return %c0_i32, %c0_i32_0 : i32, i32
  }
  func.func @transform_2(%arg0: i32) -> (i32, i32) {
    %c0_i32 = arith.constant 0 : i32
    %c0_i32_0 = arith.constant 0 : i32
    %c0_i32_1 = arith.constant 0 : i32
    return %c0_i32, %c0_i32_0 : i32, i32
  }
  func.func @transform_3(%arg0: i32) -> (i32, i32, i32) {
    %c0_i32 = arith.constant 0 : i32
    %c0_i32_0 = arith.constant 0 : i32
    %c0_i32_1 = arith.constant 0 : i32
    %c0_i32_2 = arith.constant 0 : i32
    return %c0_i32, %c0_i32_0, %c0_i32_1 : i32, i32, i32
  }
  func.func @transform_4(%arg0: i32) -> (i32, i32, i32) {
    %c0_i32 = arith.constant 0 : i32
    %c0_i32_0 = arith.constant 0 : i32
    %c0_i32_1 = arith.constant 0 : i32
    %c0_i32_2 = arith.constant 0 : i32
    return %c0_i32, %c0_i32_0, %c0_i32_1 : i32, i32, i32
  }
  func.func @transform_5(%arg0: i32) -> (i32, i32) {
    %c0_i32 = arith.constant 0 : i32
    %c0_i32_0 = arith.constant 0 : i32
    %c0_i32_1 = arith.constant 0 : i32
    return %c0_i32, %c0_i32_0 : i32, i32
  }
  func.func @transform_6(%arg0: i32) -> (i32, i32) {
    %c0_i32 = arith.constant 0 : i32
    %c0_i32_0 = arith.constant 0 : i32
    %c0_i32_1 = arith.constant 0 : i32
    return %c0_i32, %c0_i32_0 : i32, i32
  }
  func.func @transform_7(%arg0: i32) -> (i32, i32) {
    %c0_i32 = arith.constant 0 : i32
    %c0_i32_0 = arith.constant 0 : i32
    return %arg0, %c0_i32 : i32, i32
  }
}

module attributes {stable_mosaic.version = 11 : i64} {
  func.func @_fcn_kernel(%arg0: i32, %arg1: memref<8x8xf32, #tpu.memory_space<vmem>>, %arg2: memref<8x128xf32, #tpu.memory_space<vmem>>, %arg3: memref<1x128xf32, #tpu.memory_space<vmem>>, %arg4: memref<2x128x128xf32, #tpu.memory_space<vmem>>, %arg5: memref<2x1x128xf32, #tpu.memory_space<vmem>>, %arg6: memref<128x4xf32, #tpu.memory_space<vmem>>, %arg7: memref<1x4xf32, #tpu.memory_space<vmem>>, %arg8: memref<8x4xf32, #tpu.memory_space<vmem>>) attributes {dimension_semantics = [#tpu.dimension_semantics<parallel>], iteration_bounds = array<i64: 1>, scalar_prefetch = 0 : i64, scratch_operands = 0 : i64, tpu.core_type = #tpu.core_type<tc>, window_params = [{transform_indices = @transform_0, window_bounds = array<i64: 8, 8>}, {pipeline_mode = #tpu.pipeline_mode<synchronous>, transform_indices = @transform_1, window_bounds = array<i64: 8, 128>}, {pipeline_mode = #tpu.pipeline_mode<synchronous>, transform_indices = @transform_2, window_bounds = array<i64: 1, 128>}, {pipeline_mode = #tpu.pipeline_mode<synchronous>, transform_indices = @transform_3, window_bounds = array<i64: 2, 128, 128>}, {pipeline_mode = #tpu.pipeline_mode<synchronous>, transform_indices = @transform_4, window_bounds = array<i64: 2, 1, 128>}, {pipeline_mode = #tpu.pipeline_mode<synchronous>, transform_indices = @transform_5, window_bounds = array<i64: 128, 4>}, {pipeline_mode = #tpu.pipeline_mode<synchronous>, transform_indices = @transform_6, window_bounds = array<i64: 1, 4>}, {transform_indices = @transform_7, window_bounds = array<i64: 8, 4>}]} {
    %c0 = arith.constant 0 : index
    %c0_0 = arith.constant 0 : index
    %0 = vector.load %arg1[%c0, %c0_0] : memref<8x8xf32, #tpu.memory_space<vmem>>, vector<8x8xf32>
    %c0_1 = arith.constant 0 : index
    %c0_2 = arith.constant 0 : index
    %1 = vector.load %arg2[%c0_1, %c0_2] : memref<8x128xf32, #tpu.memory_space<vmem>>, vector<8x128xf32>
    %c0_3 = arith.constant 0 : index
    %c0_4 = arith.constant 0 : index
    %2 = vector.load %arg3[%c0_3, %c0_4] : memref<1x128xf32, #tpu.memory_space<vmem>>, vector<1x128xf32>
    %3 = vector.shape_cast %2 : vector<1x128xf32> to vector<1x128xf32>
    %4 = vector.broadcast %3 : vector<1x128xf32> to vector<8x128xf32>
    %5 = vector.extract_strided_slice %0 {offsets = [0, 0], sizes = [8, 1], strides = [1, 1]} : vector<8x8xf32> to vector<8x1xf32>
    %6 = vector.extract_strided_slice %1 {offsets = [0, 0], sizes = [1, 128], strides = [1, 1]} : vector<8x128xf32> to vector<1x128xf32>
    %7 = vector.broadcast %5 : vector<8x1xf32> to vector<8x128xf32>
    %8 = vector.broadcast %6 : vector<1x128xf32> to vector<8x128xf32>
    %9 = arith.mulf %7, %8 : vector<8x128xf32>
    %10 = arith.addf %4, %9 : vector<8x128xf32>
    %11 = vector.extract_strided_slice %0 {offsets = [0, 1], sizes = [8, 1], strides = [1, 1]} : vector<8x8xf32> to vector<8x1xf32>
    %12 = vector.extract_strided_slice %1 {offsets = [1, 0], sizes = [1, 128], strides = [1, 1]} : vector<8x128xf32> to vector<1x128xf32>
    %13 = vector.broadcast %11 : vector<8x1xf32> to vector<8x128xf32>
    %14 = vector.broadcast %12 : vector<1x128xf32> to vector<8x128xf32>
    %15 = arith.mulf %13, %14 : vector<8x128xf32>
    %16 = arith.addf %10, %15 : vector<8x128xf32>
    %17 = vector.extract_strided_slice %0 {offsets = [0, 2], sizes = [8, 1], strides = [1, 1]} : vector<8x8xf32> to vector<8x1xf32>
    %18 = vector.extract_strided_slice %1 {offsets = [2, 0], sizes = [1, 128], strides = [1, 1]} : vector<8x128xf32> to vector<1x128xf32>
    %19 = vector.broadcast %17 : vector<8x1xf32> to vector<8x128xf32>
    %20 = vector.broadcast %18 : vector<1x128xf32> to vector<8x128xf32>
    %21 = arith.mulf %19, %20 : vector<8x128xf32>
    %22 = arith.addf %16, %21 : vector<8x128xf32>
    %23 = vector.extract_strided_slice %0 {offsets = [0, 3], sizes = [8, 1], strides = [1, 1]} : vector<8x8xf32> to vector<8x1xf32>
    %24 = vector.extract_strided_slice %1 {offsets = [3, 0], sizes = [1, 128], strides = [1, 1]} : vector<8x128xf32> to vector<1x128xf32>
    %25 = vector.broadcast %23 : vector<8x1xf32> to vector<8x128xf32>
    %26 = vector.broadcast %24 : vector<1x128xf32> to vector<8x128xf32>
    %27 = arith.mulf %25, %26 : vector<8x128xf32>
    %28 = arith.addf %22, %27 : vector<8x128xf32>
    %29 = vector.extract_strided_slice %0 {offsets = [0, 4], sizes = [8, 1], strides = [1, 1]} : vector<8x8xf32> to vector<8x1xf32>
    %30 = vector.extract_strided_slice %1 {offsets = [4, 0], sizes = [1, 128], strides = [1, 1]} : vector<8x128xf32> to vector<1x128xf32>
    %31 = vector.broadcast %29 : vector<8x1xf32> to vector<8x128xf32>
    %32 = vector.broadcast %30 : vector<1x128xf32> to vector<8x128xf32>
    %33 = arith.mulf %31, %32 : vector<8x128xf32>
    %34 = arith.addf %28, %33 : vector<8x128xf32>
    %35 = vector.extract_strided_slice %0 {offsets = [0, 5], sizes = [8, 1], strides = [1, 1]} : vector<8x8xf32> to vector<8x1xf32>
    %36 = vector.extract_strided_slice %1 {offsets = [5, 0], sizes = [1, 128], strides = [1, 1]} : vector<8x128xf32> to vector<1x128xf32>
    %37 = vector.broadcast %35 : vector<8x1xf32> to vector<8x128xf32>
    %38 = vector.broadcast %36 : vector<1x128xf32> to vector<8x128xf32>
    %39 = arith.mulf %37, %38 : vector<8x128xf32>
    %40 = arith.addf %34, %39 : vector<8x128xf32>
    %41 = vector.extract_strided_slice %0 {offsets = [0, 6], sizes = [8, 1], strides = [1, 1]} : vector<8x8xf32> to vector<8x1xf32>
    %42 = vector.extract_strided_slice %1 {offsets = [6, 0], sizes = [1, 128], strides = [1, 1]} : vector<8x128xf32> to vector<1x128xf32>
    %43 = vector.broadcast %41 : vector<8x1xf32> to vector<8x128xf32>
    %44 = vector.broadcast %42 : vector<1x128xf32> to vector<8x128xf32>
    %45 = arith.mulf %43, %44 : vector<8x128xf32>
    %46 = arith.addf %40, %45 : vector<8x128xf32>
    %47 = vector.extract_strided_slice %0 {offsets = [0, 7], sizes = [8, 1], strides = [1, 1]} : vector<8x8xf32> to vector<8x1xf32>
    %48 = vector.extract_strided_slice %1 {offsets = [7, 0], sizes = [1, 128], strides = [1, 1]} : vector<8x128xf32> to vector<1x128xf32>
    %49 = vector.broadcast %47 : vector<8x1xf32> to vector<8x128xf32>
    %50 = vector.broadcast %48 : vector<1x128xf32> to vector<8x128xf32>
    %51 = arith.mulf %49, %50 : vector<8x128xf32>
    %52 = arith.addf %46, %51 : vector<8x128xf32>
    %53 = math.tanh %52 : vector<8x128xf32>
    %c0_5 = arith.constant 0 : index
    %c0_6 = arith.constant 0 : index
    %c0_7 = arith.constant 0 : index
    %54 = vector.load %arg4[%c0_5, %c0_6, %c0_7] : memref<2x128x128xf32, #tpu.memory_space<vmem>>, vector<1x128x128xf32>
    %55 = vector.shape_cast %54 : vector<1x128x128xf32> to vector<128x128xf32>
    %c0_8 = arith.constant 0 : index
    %c0_9 = arith.constant 0 : index
    %c0_10 = arith.constant 0 : index
    %56 = vector.load %arg5[%c0_8, %c0_9, %c0_10] : memref<2x1x128xf32, #tpu.memory_space<vmem>>, vector<1x1x128xf32>
    %57 = vector.shape_cast %56 : vector<1x1x128xf32> to vector<1x128xf32>
    %cst = arith.constant dense<0.000000e+00> : vector<8x128xf32>
    %58 = tpu.matmul %53, %55, %cst {dimension_numbers = #tpu.dot_dimension_numbers<[1], [0], [0], [1], [0, 0, 1, 1], [], []>} : vector<8x128xf32>, vector<128x128xf32>, vector<8x128xf32> -> vector<8x128xf32>
    %59 = vector.broadcast %57 : vector<1x128xf32> to vector<8x128xf32>
    %60 = arith.addf %58, %59 : vector<8x128xf32>
    %61 = math.tanh %60 : vector<8x128xf32>
    %c1 = arith.constant 1 : index
    %c0_11 = arith.constant 0 : index
    %c0_12 = arith.constant 0 : index
    %62 = vector.load %arg4[%c1, %c0_11, %c0_12] : memref<2x128x128xf32, #tpu.memory_space<vmem>>, vector<1x128x128xf32>
    %63 = vector.shape_cast %62 : vector<1x128x128xf32> to vector<128x128xf32>
    %c1_13 = arith.constant 1 : index
    %c0_14 = arith.constant 0 : index
    %c0_15 = arith.constant 0 : index
    %64 = vector.load %arg5[%c1_13, %c0_14, %c0_15] : memref<2x1x128xf32, #tpu.memory_space<vmem>>, vector<1x1x128xf32>
    %65 = vector.shape_cast %64 : vector<1x1x128xf32> to vector<1x128xf32>
    %cst_16 = arith.constant dense<0.000000e+00> : vector<8x128xf32>
    %66 = tpu.matmul %61, %63, %cst_16 {dimension_numbers = #tpu.dot_dimension_numbers<[1], [0], [0], [1], [0, 0, 1, 1], [], []>} : vector<8x128xf32>, vector<128x128xf32>, vector<8x128xf32> -> vector<8x128xf32>
    %67 = vector.broadcast %65 : vector<1x128xf32> to vector<8x128xf32>
    %68 = arith.addf %66, %67 : vector<8x128xf32>
    %69 = math.tanh %68 : vector<8x128xf32>
    %c0_17 = arith.constant 0 : index
    %c0_18 = arith.constant 0 : index
    %70 = vector.load %arg6[%c0_17, %c0_18] : memref<128x4xf32, #tpu.memory_space<vmem>>, vector<128x4xf32>
    %cst_19 = arith.constant dense<0.000000e+00> : vector<8x4xf32>
    %71 = tpu.matmul %69, %70, %cst_19 {dimension_numbers = #tpu.dot_dimension_numbers<[1], [0], [0], [1], [0, 0, 1, 1], [], []>} : vector<8x128xf32>, vector<128x4xf32>, vector<8x4xf32> -> vector<8x4xf32>
    %c0_20 = arith.constant 0 : index
    %c0_21 = arith.constant 0 : index
    %72 = vector.load %arg7[%c0_20, %c0_21] : memref<1x4xf32, #tpu.memory_space<vmem>>, vector<1x4xf32>
    %73 = vector.broadcast %72 : vector<1x4xf32> to vector<8x4xf32>
    %74 = arith.addf %71, %73 : vector<8x4xf32>
    %c0_22 = arith.constant 0 : index
    %c0_23 = arith.constant 0 : index
    %75 = vector.load %arg8[%c0_22, %c0_23] : memref<8x4xf32, #tpu.memory_space<vmem>>, vector<8x4xf32>
    tpu.vector_store %arg8[%c0_22, %c0_23], %74 {strides = array<i32>} : memref<8x4xf32, #tpu.memory_space<vmem>>, vector<8x4xf32>,
    return
  }
  func.func @transform_0(%arg0: i32) -> (i32, i32) {
    %c0_i32 = arith.constant 0 : i32
    %c0_i32_0 = arith.constant 0 : i32
    return %arg0, %c0_i32 : i32, i32
  }
  func.func @transform_1(%arg0: i32) -> (i32, i32) {
    %c0_i32 = arith.constant 0 : i32
    %c0_i32_0 = arith.constant 0 : i32
    %c0_i32_1 = arith.constant 0 : i32
    return %c0_i32, %c0_i32_0 : i32, i32
  }
  func.func @transform_2(%arg0: i32) -> (i32, i32) {
    %c0_i32 = arith.constant 0 : i32
    %c0_i32_0 = arith.constant 0 : i32
    %c0_i32_1 = arith.constant 0 : i32
    return %c0_i32, %c0_i32_0 : i32, i32
  }
  func.func @transform_3(%arg0: i32) -> (i32, i32, i32) {
    %c0_i32 = arith.constant 0 : i32
    %c0_i32_0 = arith.constant 0 : i32
    %c0_i32_1 = arith.constant 0 : i32
    %c0_i32_2 = arith.constant 0 : i32
    return %c0_i32, %c0_i32_0, %c0_i32_1 : i32, i32, i32
  }
  func.func @transform_4(%arg0: i32) -> (i32, i32, i32) {
    %c0_i32 = arith.constant 0 : i32
    %c0_i32_0 = arith.constant 0 : i32
    %c0_i32_1 = arith.constant 0 : i32
    %c0_i32_2 = arith.constant 0 : i32
    return %c0_i32, %c0_i32_0, %c0_i32_1 : i32, i32, i32
  }
  func.func @transform_5(%arg0: i32) -> (i32, i32) {
    %c0_i32 = arith.constant 0 : i32
    %c0_i32_0 = arith.constant 0 : i32
    %c0_i32_1 = arith.constant 0 : i32
    return %c0_i32, %c0_i32_0 : i32, i32
  }
  func.func @transform_6(%arg0: i32) -> (i32, i32) {
    %c0_i32 = arith.constant 0 : i32
    %c0_i32_0 = arith.constant 0 : i32
    %c0_i32_1 = arith.constant 0 : i32
    return %c0_i32, %c0_i32_0 : i32, i32
  }
  func.func @transform_7(%arg0: i32) -> (i32, i32) {
    %c0_i32 = arith.constant 0 : i32
    %c0_i32_0 = arith.constant 0 : i32
    return %arg0, %c0_i32 : i32, i32
  }
}

</mosaic_0001>

<bundles_post_ra>
// kernel: tpu_custom_call.1
= control target key start
LH: loop header
LB: loop body
LE: loop exit
PB: predicated region body
PF: predicated region fallthrough
CT: control target
= control target key end

     0   :  { %12 = vsyncpa [#allocation3], 0  ;;  %s707_s24 = smov [#allocation2]   ;;  %s872_s0 = inlined_call_operand.vmem [shape: f32[8,8], index: 0, kind: input, shape index: {}]   ;;  %s873_s1 = inlined_call_operand.vmem [shape: f32[8,128], index: 1, kind: input, shape index: {}]   ;;  %s874_s2 = inlined_call_operand.vmem [shape: f32[1,128], index: 2, kind: input, shape index: {}]   ;;  %s875_s3 = inlined_call_operand.hbm [shape: f32[2,128,128], index: 3, kind: input, shape index: {}]   ;;  %s876_s4 = inlined_call_operand.vmem [shape: f32[2,1,128], index: 4, kind: input, shape index: {}]   ;;  %s877_s5 = inlined_call_operand.vmem [shape: f32[128,4], index: 5, kind: input, shape index: {}]   ;;  %s878_s6 = inlined_call_operand.vmem [shape: f32[1,4], index: 6, kind: input, shape index: {}]   ;;  %s879_s7 = inlined_call_operand.vmem [shape: f32[8,4], index: 7, kind: output, shape index: {}]  }
   0x1   :  { %s24_s25 = sshll.u32 %s707_s24, 4  ;;  %s683_s28 = scalar_lea.hbm %s875_s3, 4096  ;;  %s25_s25 = int_to_ptr.vmem [resolvable:$true] %s24_s25 }
   0x2   :  { %p684_p0 = scmp.ne.s32.totalorder %s875_s3, %s683_s28  ;;  %p687_p1 = scmp.lt.u32.totalorder %s683_s28, %s875_s3 }
   0x4   :  { %p689_p2 = pnand %p687_p1, %p684_p0 }
   0x6   :  { %692 = shalt.err (!%p689_p2)
}
   0x7   :  { %s693_s10 = scalar_lea.vmem %s25_s25, 4096  ;;  %p698_p4 = scmp.lt.s32.totalorder %s25_s25, %s25_s25 }
   0x8   :  { %p694_p3 = scmp.ne.s32.totalorder %s25_s25, %s693_s10  ;;  %p699_p5 = scmp.lt.s32.totalorder %s693_s10, %s693_s10 }
   0xa   :  { %p700_p6 = por %p699_p5, %p698_p4 }
   0xc   :  { %p701_p7 = pnand %p700_p6, %p694_p3 }
   0xe   :  { %704 = shalt.err (!%p701_p7)
}
   0xf   :  { %s708_s11 = smov 128   ;;  %s709_s12 = smov 8  }
  0x10   :  { %30 = dma.hbm_to_vmem [thread:$0]  %s875_s3, 4096, %s25_s25, [#allocation3], %s708_s11, %s708_s11, %s709_s12  }
  0x11   :  { %705 = dma.done.wait [#allocation3], 4096  }
  0x12   :  { %706 = vsyncadd [#allocation3], 4294963200  ;;  %v710_v0 = vmov 2   ;;  %v711_v1 = vmov 0   ;;  %v40_v2 = vld [vmem:[%s872_s0] sm:$0xff]  ;;  %v132_v4 = vld [vmem:[#allocation2 + $0x8] sm:$0xff]  ;;  %v54_v50 = vlaneseq }
  0x13   :  { %670 = vset.pattern.permute.xlu1 %v710_v0  ;;  %668 = vset.pattern.permute.xlu0 %v711_v1  ;;  %v131_v3 = vld [vmem:[#allocation2] sm:$0xff]  ;;  %v712_v6 = vmov 0.0|0.0   ;;  %v713_v7 = vmov 3   ;;  %v714_v8 = vmov 1   ;;  %v133_v9 = vld [vmem:[#allocation2 + $0x10] sm:$0xff]  ;;  %v134_v10 = vld [vmem:[#allocation2 + $0x18] sm:$0xff] }
  0x14   :  { %71 = vperm.xlu1 %670, %v40_v2   ;;  %51 = vperm.xlu0 %668, %v40_v2   ;;  %v583_v5 = vpack.c.bf16 %v132_v4, %v131_v3  ;;  %v586_v11 = vpack.c.bf16 %v134_v10, %v133_v9  ;;  %v715_v12 = vmov 4   ;;  %v716_v13 = vmov 5   ;;  %v135_v14 = vld [vmem:[#allocation2 + $0x20] sm:$0xff]  ;;  %v136_v15 = vld [vmem:[#allocation2 + $0x28] sm:$0xff]  ;;  %v137_v17 = vld [vmem:[#allocation2 + $0x30] sm:$0xff] }
  0x15   :  { %582 = vmatprep.subr.bf16.mxu0 %v712_v6  ;;  %606 = vmatprep.subr.bf16.mxu1 %v712_v6  ;;  %v589_v16 = vpack.c.bf16 %v136_v15, %v135_v14  ;;  %v138_v18 = vld [vmem:[#allocation2 + $0x38] sm:$0xff]  ;;  %v717_v19 = vmov 6   ;;  %v718_v20 = vmov 7   ;;  %v139_v22 = vld [vmem:[#allocation2 + $0x40] sm:$0xff]  ;;  %v140_v23 = vld [vmem:[#allocation2 + $0x48] sm:$0xff]  ;;  %vm719_vm0 = vmmov 0  }
  0x16   :  { %584 = vmatpush3.bf16.msra.mxu0 %v583_v5  ;;  %v592_v21 = vpack.c.bf16 %v138_v18, %v137_v17  ;;  %v595_v24 = vpack.c.bf16 %v140_v23, %v139_v22  ;;  %v141_v25 = vld [vmem:[#allocation2 + $0x50] sm:$0xff]  ;;  %v142_v26 = vld [vmem:[#allocation2 + $0x58] sm:$0xff]  ;;  %v143_v28 = vld [vmem:[#allocation2 + $0x60] sm:$0xff]  ;;  %v720_v30 = vmov 0.0   ;;  %v55_v51 = vshrl.u32 %v54_v50, 7 }
  0x17   :  { %585 = vmatprep.subr.bf16.mxu0 %v712_v6  ;;  %v598_v27 = vpack.c.bf16 %v142_v26, %v141_v25  ;;  %v144_v29 = vld [vmem:[#allocation2 + $0x68] sm:$0xff]  ;;  %509 = vmatprep.mubr.msk.f32.mxu0 %vm719_vm0, %v720_v30  ;;  %v145_v32 = vld [vmem:[#allocation2 + $0x70] sm:$0xff]  ;;  %v146_v33 = vld [vmem:[#allocation2 + $0x78] sm:$0xff]  ;;  %vm414_vm1 = vcmask 31744  }
  0x18   :  { %671 = vset.pattern.permute.xlu1 %v713_v7  ;;  %669 = vset.pattern.permute.xlu0 %v714_v8  ;;  %v601_v31 = vpack.c.bf16 %v144_v29, %v143_v28  ;;  %v604_v34 = vpack.c.bf16 %v146_v33, %v145_v32  ;;  %v226_v35 = vld [vmem:[#allocation2 + $0x80] sm:$0xff]  ;;  %v227_v36 = vld [vmem:[#allocation2 + $0x88] sm:$0xff]  ;;  %v228_v37 = vld [vmem:[#allocation2 + $0x90] sm:$0xff]  ;;  %v56_v52 = vsub.s32 0, %v55_v51  ;;  %v66_v55 = vsub.s32 1, %v55_v51 }
  0x19   :  { %81 = vperm.xlu1 %671, %v40_v2   ;;  %61 = vperm.xlu0 %669, %v40_v2   ;;  %v607_v38 = vpack.c.bf16 %v227_v36, %v226_v35  ;;  %v229_v39 = vld [vmem:[#allocation2 + $0x98] sm:$0xff]  ;;  %v230_v41 = vld [vmem:[#allocation2 + $0xa0] sm:$0xff]  ;;  %v231_v42 = vld [vmem:[#allocation2 + $0xa8] sm:$0xff]  ;;  %v76_v56 = vsub.s32 2, %v55_v51  ;;  %v86_v61 = vsub.s32 3, %v55_v51  ;;  %v96_v63 = vsub.s32 4, %v55_v51 }
  0x1a   :  { %587 = vmatpush3.bf16.msra.mxu0 %v586_v11  ;;  %544 = vmatprep.mubr.msk.f32.mxu1 %vm719_vm0, %v720_v30  ;;  %v610_v40 = vpack.c.bf16 %v229_v39, %v228_v37  ;;  %v613_v43 = vpack.c.bf16 %v231_v42, %v230_v41  ;;  %v232_v44 = vld [vmem:[#allocation2 + $0xb0] sm:$0xff]  ;;  %v233_v45 = vld [vmem:[#allocation2 + $0xb8] sm:$0xff]  ;;  %v234_v47 = vld [vmem:[#allocation2 + $0xc0] sm:$0xff]  ;;  %v106_v4 = vsub.s32 5, %v55_v51 }
  0x1b   :  { %588 = vmatprep.subr.bf16.mxu0 %v712_v6  ;;  %608 = vmatpush3.bf16.msra.mxu1 %v607_v38  ;;  %v616_v46 = vpack.c.bf16 %v233_v45, %v232_v44  ;;  %v235_v48 = vld [vmem:[#allocation2 + $0xc8] sm:$0xff]  ;;  %v41_v53 = vld [vmem:[%s873_s1] sm:$0xff]  ;;  %v236_v33 = vld [vmem:[#allocation2 + $0xd0] sm:$0xff] }
  0x1c   :  { %609 = vmatprep.subr.bf16.mxu1 %v712_v6  ;;  %v619_v49 = vpack.c.bf16 %v235_v48, %v234_v47  ;;  %v57_v54 = vrot.slane %v41_v53, %v56_v52  ;;  %v421_v59 = vld [vmem:[%s874_s2] ss:$0 sm:$0xff]  ;;  %v67_v62 = vrot.slane %v41_v53, %v66_v55  ;;  %v77_v0 = vrot.slane %v41_v53, %v76_v56  ;;  %v239_v37 = vld [vmem:[#allocation2 + $0xe8] sm:$0xff]  ;;  %v240_v39 = vld [vmem:[#allocation2 + $0xf0] sm:$0xff] }
  0x1d   :  { %672 = vset.pattern.permute.xlu1 %v715_v12  ;;  %673 = vset.pattern.permute.xlu0 %v716_v13  ;;  %v87_v5 = vrot.slane %v41_v53, %v86_v61  ;;  %v97_v8 = vrot.slane %v41_v53, %v96_v63  ;;  %v107_v11 = vrot.slane %v41_v53, %v106_v4  ;;  %v116_v12 = vsub.s32 6, %v55_v51  ;;  %v238_v36 = vld [vmem:[#allocation2 + $0xe0] sm:$0xff]  ;;  %v322_v42 = vld [vmem:[%s877_s5 + $0x8] sm:$0xff]  ;;  %v324_v45 = vld [vmem:[%s877_s5 + $0x18] sm:$0xff] }
  0x1e   :  { %91 = vperm.xlu1 %672, %v40_v2   ;;  %101 = vperm.xlu0 %673, %v40_v2   ;;  %v625_v38 = vpack.c.bf16 %v239_v37, %v238_v36  ;;  %v325_v47 = vld [vmem:[%s877_s5 + $0x20] sm:$0xff]  ;;  %v326_v48 = vld [vmem:[%s877_s5 + $0x28] sm:$0xff]  ;;  %v327_v50 = vld [vmem:[%s877_s5 + $0x30] sm:$0xff] }
  0x1f   :  { %590 = vmatpush3.bf16.msra.mxu0 %v589_v16  ;;  %611 = vmatpush3.bf16.msra.mxu1 %v610_v40  ;;  %v241_v40 = vld [vmem:[#allocation2 + $0xf8] sm:$0xff]  ;;  %v422_v56 = vld [vmem:[%s876_s4] ss:$0 sm:$0xff]  ;;  %v331_v61 = vld [vmem:[%s877_s5 + $0x50] sm:$0xff] }
  0x20   :  { %591 = vmatprep.subr.bf16.mxu0 %v712_v6  ;;  %612 = vmatprep.subr.bf16.mxu1 %v712_v6  ;;  %v628_v41 = vpack.c.bf16 %v241_v40, %v240_v39  ;;  %v336_v4 = vld [vmem:[%s877_s5 + $0x78] sm:$0xff] }
  0x22   :  { %674 = vset.pattern.permute.xlu1 %v717_v19  ;;  %676 = vset.pattern.permute.xlu0 %v718_v20 }
  0x23   :  { %111 = vperm.xlu1 %674, %v40_v2   ;;  %593 = vmatpush3.bf16.msra.mxu0 %v592_v21  ;;  %v126_v21 = vsub.s32 7, %v55_v51  ;;  %v328_v51 = vld [vmem:[%s877_s5 + $0x38] sm:$0xff] }
  0x24   :  { %594 = vmatprep.subr.bf16.mxu0 %v712_v6  ;;  %614 = vmatpush3.bf16.msra.mxu1 %v613_v43  ;;  %v323_v43 = vld [vmem:[%s877_s5 + $0x10] sm:$0xff]  ;;  %v640_v52 = vpack.c.bf16 %v328_v51, %v327_v50 }
  0x25   :  { %615 = vmatprep.subr.bf16.mxu1 %v712_v6  ;;  %v127_v26 = vrot.slane %v41_v53, %v126_v21 }
  0x27   :  { %675 = vset.pattern.permute.xlu1 %v718_v20  ;;  %596 = vmatpush3.bf16.msra.mxu0 %v595_v24  ;;  %v117_v20 = vrot.slane %v41_v53, %v116_v12  ;;  %v329_v53 = vld [vmem:[%s877_s5 + $0x40] sm:$0xff] }
  0x28   :  { %121 = vperm.xlu1 %675, %v40_v2   ;;  %597 = vmatprep.subr.bf16.mxu0 %v712_v6  ;;  %v425_v12 = vld [vmem:[%s878_s6] ss:$0 sm:$0xff] }
  0x29   :  { %617 = vmatpush3.bf16.msra.mxu1 %v616_v46  ;;  %v634_v46 = vpack.c.bf16 %v324_v45, %v323_v43 }
  0x2a   :  { %618 = vmatprep.subr.bf16.mxu1 %v712_v6 }
  0x2b   :  { %599 = vmatpush3.bf16.msra.mxu0 %v598_v27 }
  0x2c   :  { %600 = vmatprep.subr.bf16.mxu0 %v712_v6 }
  0x2d   :  { %620 = vmatpush3.bf16.msra.mxu1 %v619_v49  ;;  %v637_v49 = vpack.c.bf16 %v326_v48, %v325_v47 }
  0x2e   :  { %621 = vmatprep.subr.bf16.mxu1 %v712_v6 }
  0x2f   :  { %602 = vmatpush3.bf16.msra.mxu0 %v601_v31 }
  0x30   :  { %603 = vmatprep.subr.bf16.mxu0 %v712_v6 }
  0x33   :  { %605 = vmatpush3.bf16.msra.mxu0 %v604_v34  ;;  %v237_v34 = vld [vmem:[#allocation2 + $0xd8] sm:$0xff] }
  0x34   :  { %630 = vmatprep.subr.bf16.mxu0 %v712_v6  ;;  %v622_v35 = vpack.c.bf16 %v237_v34, %v236_v33 }
  0x36   :  { %623 = vmatpush3.bf16.msra.mxu1 %v622_v35 }
  0x37   :  { %624 = vmatprep.subr.bf16.mxu1 %v712_v6 }
  0x3a   :  { %626 = vmatpush3.bf16.msra.mxu1 %v625_v38 }
  0x3b   :  { %627 = vmatprep.subr.bf16.mxu1 %v712_v6 }
  0x3e   :  { %629 = vmatpush3.bf16.msra.mxu1 %v628_v41 }
  0x93   :  { %v72_v57 = vpop.permute.xlu1 %71  ;;  %v52_v58 = vpop.permute.xlu0 %51 }
  0x94   :  { %v58_v60 = vmul.f32 %v57_v54, %v52_v58  ;;  %v78_v9 = vmul.f32 %v77_v0, %v72_v57  ;;  %v330_v54 = vld [vmem:[%s877_s5 + $0x48] sm:$0xff]  ;;  %v333_v0 = vld [vmem:[%s877_s5 + $0x60] sm:$0xff] }
  0x95   :  { %v643_v55 = vpack.c.bf16 %v330_v54, %v329_v53 }
  0x96   :  { %v59_v1 = vadd.f32 %v421_v59, %v58_v60 }
  0x98   :  { %v82_v2 = vpop.permute.xlu1 %81  ;;  %v62_v3 = vpop.permute.xlu0 %61 }
  0x99   :  { %v68_v7 = vmul.f32 %v67_v62, %v62_v3  ;;  %v88_v13 = vmul.f32 %v87_v5, %v82_v2  ;;  %v332_v62 = vld [vmem:[%s877_s5 + $0x58] sm:$0xff]  ;;  %v335_v3 = vld [vmem:[%s877_s5 + $0x70] sm:$0xff] }
  0x9a   :  { %v646_v63 = vpack.c.bf16 %v332_v62, %v331_v61  ;;  %v652_v5 = vpack.c.bf16 %v336_v4, %v335_v3 }
  0x9b   :  { %v69_v10 = vadd.f32 %v68_v7, %v59_v1  ;;  %v334_v1 = vld [vmem:[%s877_s5 + $0x68] sm:$0xff]  ;;  %v424_v7 = vld [vmem:[%s876_s4 + $0x1] ss:$0 sm:$0xff] }
  0x9c   :  { %v649_v2 = vpack.c.bf16 %v334_v1, %v333_v0 }
  0x9d   :  { %v79_v14 = vadd.f32 %v78_v9, %v69_v10  ;;  %v92_v15 = vpop.permute.xlu1 %91  ;;  %v102_v16 = vpop.permute.xlu0 %101 }
  0x9e   :  { %v98_v17 = vmul.f32 %v97_v8, %v92_v15  ;;  %v108_v19 = vmul.f32 %v107_v11, %v102_v16 }
  0x9f   :  { %v89_v18 = vadd.f32 %v88_v13, %v79_v14 }
  0xa1   :  { %v99_v22 = vadd.f32 %v98_v17, %v89_v18 }
  0xa2   :  { %v112_v23 = vpop.permute.xlu1 %111 }
  0xa3   :  { %v109_v24 = vadd.f32 %v108_v19, %v99_v22  ;;  %v118_v25 = vmul.f32 %v117_v20, %v112_v23 }
  0xa5   :  { %v119_v28 = vadd.f32 %v118_v25, %v109_v24 }
  0xa7   :  { %v122_v27 = vpop.permute.xlu1 %121 }
  0xa8   :  { %v128_v29 = vmul.f32 %v127_v26, %v122_v27 }
  0xaa   :  { %v129_v31 = vadd.f32 %v128_v29, %v119_v28 }
  0xac   :  { %677 = vtanh.f32 %v129_v31 }
  0xb6   :  { %v678_v32 = vpop.eup %677 }
  0xb7   :  { %510 = vmatmul.mubr.f32.vlgmr.msra.gmra.mrb[0].mxu0 %v678_v32 }
  0xb8   :  { %579 = vmatprep.mubr.msk.f32.mxu0 %vm719_vm0, %v720_v30  ;;  %v321_v30 = vld [vmem:[%s877_s5] sm:$0xff] }
  0xb9   :  { %v631_v44 = vpack.c.bf16 %v322_v42, %v321_v30 }
  0xbb   :  { %632 = vmatpush3.bf16.msra.mxu0 %v631_v44 }
  0xbc   :  { %633 = vmatprep.subr.bf16.mxu0 %v712_v6 }
  0xbf   :  { %635 = vmatpush3.bf16.msra.mxu0 %v634_v46 }
  0xc0   :  { %636 = vmatprep.subr.bf16.mxu0 %v712_v6 }
  0xc3   :  { %638 = vmatpush3.bf16.msra.mxu0 %v637_v49 }
  0xc4   :  { %639 = vmatprep.subr.bf16.mxu0 %v712_v6 }
  0xc7   :  { %641 = vmatpush3.bf16.msra.mxu0 %v640_v52 }
  0xc8   :  { %642 = vmatprep.subr.bf16.mxu0 %v712_v6 }
  0xcb   :  { %644 = vmatpush3.bf16.msra.mxu0 %v643_v55 }
  0xcc   :  { %645 = vmatprep.subr.bf16.mxu0 %v712_v6 }
  0xcf   :  { %647 = vmatpush3.bf16.msra.mxu0 %v646_v63 }
  0xd0   :  { %648 = vmatprep.subr.bf16.mxu0 %v712_v6 }
  0xd3   :  { %650 = vmatpush3.bf16.msra.mxu0 %v649_v2 }
  0xd4   :  { %651 = vmatprep.subr.bf16.mxu0 %v712_v6 }
  0xd7   :  { %653 = vmatpush3.bf16.msra.mxu0 %v652_v5 }
 0x18a   :  { %v220_v57 = vpop.f32.mrb[0].mxu0 }
 0x18b   :  { %v221_v58 = vadd.f32 %v422_v56, %v220_v57  ;;  %v511_v59 = vpop.f32.mrb[1].mxu0 }
 0x18d   :  { %679 = vtanh.f32 %v221_v58 }
 0x197   :  { %v680_v60 = vpop.eup %679 }
 0x198   :  { %545 = vmatmul.mubr.f32.vlgmr.msra.gmra.mrb[0].mxu1 %v680_v60 }
 0x26b   :  { %v316_v8 = vpop.f32.mrb[0].mxu1 }
 0x26c   :  { %v317_v9 = vadd.f32 %v424_v7, %v316_v8  ;;  %v546_v10 = vpop.f32.mrb[1].mxu1 }
 0x26e   :  { %681 = vtanh.f32 %v317_v9 }
 0x278   :  { %v682_v11 = vpop.eup %681 }
 0x279   :  { %580 = vmatmul.mubr.f32.vlgmr.msra.gmra.mrb[2].mxu0 %v682_v11 }
 0x34c   :  { %v410_v13 = vpop.f32.mrb[2].mxu0 }
 0x34d   :  { %v411_v14 = vadd.f32 %v425_v12, %v410_v13  ;;  %v581_v15 = vpop.f32.mrb[3].mxu0 }
 0x34f   :  { %415 = vst.msk [vmem:[%s879_s7] sm:$0xff] %vm414_vm1, %v411_v14 }
 0x350   :  { %420 = vsyncpa [#allocation3], 1 }

// kernel: tpu_custom_call.1
= control target key start
LH: loop header
LB: loop body
LE: loop exit
PB: predicated region body
PF: predicated region fallthrough
CT: control target
= control target key end

     0   :  { %12 = vsyncpa [#allocation3], 0  ;;  %s707_s24 = smov [#allocation2]   ;;  %s872_s0 = inlined_call_operand.vmem [shape: f32[8,8], index: 0, kind: input, shape index: {}]   ;;  %s873_s1 = inlined_call_operand.vmem [shape: f32[8,128], index: 1, kind: input, shape index: {}]   ;;  %s874_s2 = inlined_call_operand.vmem [shape: f32[1,128], index: 2, kind: input, shape index: {}]   ;;  %s875_s3 = inlined_call_operand.hbm [shape: f32[2,128,128], index: 3, kind: input, shape index: {}]   ;;  %s876_s4 = inlined_call_operand.vmem [shape: f32[2,1,128], index: 4, kind: input, shape index: {}]   ;;  %s877_s5 = inlined_call_operand.vmem [shape: f32[128,4], index: 5, kind: input, shape index: {}]   ;;  %s878_s6 = inlined_call_operand.vmem [shape: f32[1,4], index: 6, kind: input, shape index: {}]   ;;  %s879_s7 = inlined_call_operand.vmem [shape: f32[8,4], index: 7, kind: output, shape index: {}]  }
   0x1   :  { %s24_s25 = sshll.u32 %s707_s24, 4  ;;  %s683_s28 = scalar_lea.hbm %s875_s3, 4096  ;;  %s25_s25 = int_to_ptr.vmem [resolvable:$true] %s24_s25 }
   0x2   :  { %p684_p0 = scmp.ne.s32.totalorder %s875_s3, %s683_s28  ;;  %p687_p1 = scmp.lt.u32.totalorder %s683_s28, %s875_s3 }
   0x4   :  { %p689_p2 = pnand %p687_p1, %p684_p0 }
   0x6   :  { %692 = shalt.err (!%p689_p2)
}
   0x7   :  { %s693_s10 = scalar_lea.vmem %s25_s25, 4096  ;;  %p698_p4 = scmp.lt.s32.totalorder %s25_s25, %s25_s25 }
   0x8   :  { %p694_p3 = scmp.ne.s32.totalorder %s25_s25, %s693_s10  ;;  %p699_p5 = scmp.lt.s32.totalorder %s693_s10, %s693_s10 }
   0xa   :  { %p700_p6 = por %p699_p5, %p698_p4 }
   0xc   :  { %p701_p7 = pnand %p700_p6, %p694_p3 }
   0xe   :  { %704 = shalt.err (!%p701_p7)
}
   0xf   :  { %s708_s11 = smov 128   ;;  %s709_s12 = smov 8  }
  0x10   :  { %30 = dma.hbm_to_vmem [thread:$0]  %s875_s3, 4096, %s25_s25, [#allocation3], %s708_s11, %s708_s11, %s709_s12  }
  0x11   :  { %705 = dma.done.wait [#allocation3], 4096  }
  0x12   :  { %706 = vsyncadd [#allocation3], 4294963200  ;;  %v710_v0 = vmov 2   ;;  %v711_v1 = vmov 0   ;;  %v40_v2 = vld [vmem:[%s872_s0] sm:$0xff]  ;;  %v132_v4 = vld [vmem:[#allocation2 + $0x8] sm:$0xff]  ;;  %v54_v50 = vlaneseq }
  0x13   :  { %670 = vset.pattern.permute.xlu1 %v710_v0  ;;  %668 = vset.pattern.permute.xlu0 %v711_v1  ;;  %v131_v3 = vld [vmem:[#allocation2] sm:$0xff]  ;;  %v712_v6 = vmov 0.0|0.0   ;;  %v713_v7 = vmov 3   ;;  %v714_v8 = vmov 1   ;;  %v133_v9 = vld [vmem:[#allocation2 + $0x10] sm:$0xff]  ;;  %v134_v10 = vld [vmem:[#allocation2 + $0x18] sm:$0xff] }
  0x14   :  { %71 = vperm.xlu1 %670, %v40_v2   ;;  %51 = vperm.xlu0 %668, %v40_v2   ;;  %v583_v5 = vpack.c.bf16 %v132_v4, %v131_v3  ;;  %v586_v11 = vpack.c.bf16 %v134_v10, %v133_v9  ;;  %v715_v12 = vmov 4   ;;  %v716_v13 = vmov 5   ;;  %v135_v14 = vld [vmem:[#allocation2 + $0x20] sm:$0xff]  ;;  %v136_v15 = vld [vmem:[#allocation2 + $0x28] sm:$0xff]  ;;  %v137_v17 = vld [vmem:[#allocation2 + $0x30] sm:$0xff] }
  0x15   :  { %582 = vmatprep.subr.bf16.mxu0 %v712_v6  ;;  %606 = vmatprep.subr.bf16.mxu1 %v712_v6  ;;  %v589_v16 = vpack.c.bf16 %v136_v15, %v135_v14  ;;  %v138_v18 = vld [vmem:[#allocation2 + $0x38] sm:$0xff]  ;;  %v717_v19 = vmov 6   ;;  %v718_v20 = vmov 7   ;;  %v139_v22 = vld [vmem:[#allocation2 + $0x40] sm:$0xff]  ;;  %v140_v23 = vld [vmem:[#allocation2 + $0x48] sm:$0xff]  ;;  %vm719_vm0 = vmmov 0  }
  0x16   :  { %584 = vmatpush3.bf16.msra.mxu0 %v583_v5  ;;  %v592_v21 = vpack.c.bf16 %v138_v18, %v137_v17  ;;  %v595_v24 = vpack.c.bf16 %v140_v23, %v139_v22  ;;  %v141_v25 = vld [vmem:[#allocation2 + $0x50] sm:$0xff]  ;;  %v142_v26 = vld [vmem:[#allocation2 + $0x58] sm:$0xff]  ;;  %v143_v28 = vld [vmem:[#allocation2 + $0x60] sm:$0xff]  ;;  %v720_v30 = vmov 0.0   ;;  %v55_v51 = vshrl.u32 %v54_v50, 7 }
  0x17   :  { %585 = vmatprep.subr.bf16.mxu0 %v712_v6  ;;  %v598_v27 = vpack.c.bf16 %v142_v26, %v141_v25  ;;  %v144_v29 = vld [vmem:[#allocation2 + $0x68] sm:$0xff]  ;;  %509 = vmatprep.mubr.msk.f32.mxu0 %vm719_vm0, %v720_v30  ;;  %v145_v32 = vld [vmem:[#allocation2 + $0x70] sm:$0xff]  ;;  %v146_v33 = vld [vmem:[#allocation2 + $0x78] sm:$0xff]  ;;  %vm414_vm1 = vcmask 31744  }
  0x18   :  { %671 = vset.pattern.permute.xlu1 %v713_v7  ;;  %669 = vset.pattern.permute.xlu0 %v714_v8  ;;  %v601_v31 = vpack.c.bf16 %v144_v29, %v143_v28  ;;  %v604_v34 = vpack.c.bf16 %v146_v33, %v145_v32  ;;  %v226_v35 = vld [vmem:[#allocation2 + $0x80] sm:$0xff]  ;;  %v227_v36 = vld [vmem:[#allocation2 + $0x88] sm:$0xff]  ;;  %v228_v37 = vld [vmem:[#allocation2 + $0x90] sm:$0xff]  ;;  %v56_v52 = vsub.s32 0, %v55_v51  ;;  %v66_v55 = vsub.s32 1, %v55_v51 }
  0x19   :  { %81 = vperm.xlu1 %671, %v40_v2   ;;  %61 = vperm.xlu0 %669, %v40_v2   ;;  %v607_v38 = vpack.c.bf16 %v227_v36, %v226_v35  ;;  %v229_v39 = vld [vmem:[#allocation2 + $0x98] sm:$0xff]  ;;  %v230_v41 = vld [vmem:[#allocation2 + $0xa0] sm:$0xff]  ;;  %v231_v42 = vld [vmem:[#allocation2 + $0xa8] sm:$0xff]  ;;  %v76_v56 = vsub.s32 2, %v55_v51  ;;  %v86_v61 = vsub.s32 3, %v55_v51  ;;  %v96_v63 = vsub.s32 4, %v55_v51 }
  0x1a   :  { %587 = vmatpush3.bf16.msra.mxu0 %v586_v11  ;;  %544 = vmatprep.mubr.msk.f32.mxu1 %vm719_vm0, %v720_v30  ;;  %v610_v40 = vpack.c.bf16 %v229_v39, %v228_v37  ;;  %v613_v43 = vpack.c.bf16 %v231_v42, %v230_v41  ;;  %v232_v44 = vld [vmem:[#allocation2 + $0xb0] sm:$0xff]  ;;  %v233_v45 = vld [vmem:[#allocation2 + $0xb8] sm:$0xff]  ;;  %v234_v47 = vld [vmem:[#allocation2 + $0xc0] sm:$0xff]  ;;  %v106_v4 = vsub.s32 5, %v55_v51 }
  0x1b   :  { %588 = vmatprep.subr.bf16.mxu0 %v712_v6  ;;  %608 = vmatpush3.bf16.msra.mxu1 %v607_v38  ;;  %v616_v46 = vpack.c.bf16 %v233_v45, %v232_v44  ;;  %v235_v48 = vld [vmem:[#allocation2 + $0xc8] sm:$0xff]  ;;  %v41_v53 = vld [vmem:[%s873_s1] sm:$0xff]  ;;  %v236_v33 = vld [vmem:[#allocation2 + $0xd0] sm:$0xff] }
  0x1c   :  { %609 = vmatprep.subr.bf16.mxu1 %v712_v6  ;;  %v619_v49 = vpack.c.bf16 %v235_v48, %v234_v47  ;;  %v57_v54 = vrot.slane %v41_v53, %v56_v52  ;;  %v421_v59 = vld [vmem:[%s874_s2] ss:$0 sm:$0xff]  ;;  %v67_v62 = vrot.slane %v41_v53, %v66_v55  ;;  %v77_v0 = vrot.slane %v41_v53, %v76_v56  ;;  %v239_v37 = vld [vmem:[#allocation2 + $0xe8] sm:$0xff]  ;;  %v240_v39 = vld [vmem:[#allocation2 + $0xf0] sm:$0xff] }
  0x1d   :  { %672 = vset.pattern.permute.xlu1 %v715_v12  ;;  %673 = vset.pattern.permute.xlu0 %v716_v13  ;;  %v87_v5 = vrot.slane %v41_v53, %v86_v61  ;;  %v97_v8 = vrot.slane %v41_v53, %v96_v63  ;;  %v107_v11 = vrot.slane %v41_v53, %v106_v4  ;;  %v116_v12 = vsub.s32 6, %v55_v51  ;;  %v238_v36 = vld [vmem:[#allocation2 + $0xe0] sm:$0xff]  ;;  %v322_v42 = vld [vmem:[%s877_s5 + $0x8] sm:$0xff]  ;;  %v324_v45 = vld [vmem:[%s877_s5 + $0x18] sm:$0xff] }
  0x1e   :  { %91 = vperm.xlu1 %672, %v40_v2   ;;  %101 = vperm.xlu0 %673, %v40_v2   ;;  %v625_v38 = vpack.c.bf16 %v239_v37, %v238_v36  ;;  %v325_v47 = vld [vmem:[%s877_s5 + $0x20] sm:$0xff]  ;;  %v326_v48 = vld [vmem:[%s877_s5 + $0x28] sm:$0xff]  ;;  %v327_v50 = vld [vmem:[%s877_s5 + $0x30] sm:$0xff] }
  0x1f   :  { %590 = vmatpush3.bf16.msra.mxu0 %v589_v16  ;;  %611 = vmatpush3.bf16.msra.mxu1 %v610_v40  ;;  %v241_v40 = vld [vmem:[#allocation2 + $0xf8] sm:$0xff]  ;;  %v422_v56 = vld [vmem:[%s876_s4] ss:$0 sm:$0xff]  ;;  %v331_v61 = vld [vmem:[%s877_s5 + $0x50] sm:$0xff] }
  0x20   :  { %591 = vmatprep.subr.bf16.mxu0 %v712_v6  ;;  %612 = vmatprep.subr.bf16.mxu1 %v712_v6  ;;  %v628_v41 = vpack.c.bf16 %v241_v40, %v240_v39  ;;  %v336_v4 = vld [vmem:[%s877_s5 + $0x78] sm:$0xff] }
  0x22   :  { %674 = vset.pattern.permute.xlu1 %v717_v19  ;;  %676 = vset.pattern.permute.xlu0 %v718_v20 }
  0x23   :  { %111 = vperm.xlu1 %674, %v40_v2   ;;  %593 = vmatpush3.bf16.msra.mxu0 %v592_v21  ;;  %v126_v21 = vsub.s32 7, %v55_v51  ;;  %v328_v51 = vld [vmem:[%s877_s5 + $0x38] sm:$0xff] }
  0x24   :  { %594 = vmatprep.subr.bf16.mxu0 %v712_v6  ;;  %614 = vmatpush3.bf16.msra.mxu1 %v613_v43  ;;  %v323_v43 = vld [vmem:[%s877_s5 + $0x10] sm:$0xff]  ;;  %v640_v52 = vpack.c.bf16 %v328_v51, %v327_v50 }
  0x25   :  { %615 = vmatprep.subr.bf16.mxu1 %v712_v6  ;;  %v127_v26 = vrot.slane %v41_v53, %v126_v21 }
  0x27   :  { %675 = vset.pattern.permute.xlu1 %v718_v20  ;;  %596 = vmatpush3.bf16.msra.mxu0 %v595_v24  ;;  %v117_v20 = vrot.slane %v41_v53, %v116_v12  ;;  %v329_v53 = vld [vmem:[%s877_s5 + $0x40] sm:$0xff] }
  0x28   :  { %121 = vperm.xlu1 %675, %v40_v2   ;;  %597 = vmatprep.subr.bf16.mxu0 %v712_v6  ;;  %v425_v12 = vld [vmem:[%s878_s6] ss:$0 sm:$0xff] }
  0x29   :  { %617 = vmatpush3.bf16.msra.mxu1 %v616_v46  ;;  %v634_v46 = vpack.c.bf16 %v324_v45, %v323_v43 }
  0x2a   :  { %618 = vmatprep.subr.bf16.mxu1 %v712_v6 }
  0x2b   :  { %599 = vmatpush3.bf16.msra.mxu0 %v598_v27 }
  0x2c   :  { %600 = vmatprep.subr.bf16.mxu0 %v712_v6 }
  0x2d   :  { %620 = vmatpush3.bf16.msra.mxu1 %v619_v49  ;;  %v637_v49 = vpack.c.bf16 %v326_v48, %v325_v47 }
  0x2e   :  { %621 = vmatprep.subr.bf16.mxu1 %v712_v6 }
  0x2f   :  { %602 = vmatpush3.bf16.msra.mxu0 %v601_v31 }
  0x30   :  { %603 = vmatprep.subr.bf16.mxu0 %v712_v6 }
  0x33   :  { %605 = vmatpush3.bf16.msra.mxu0 %v604_v34  ;;  %v237_v34 = vld [vmem:[#allocation2 + $0xd8] sm:$0xff] }
  0x34   :  { %630 = vmatprep.subr.bf16.mxu0 %v712_v6  ;;  %v622_v35 = vpack.c.bf16 %v237_v34, %v236_v33 }
  0x36   :  { %623 = vmatpush3.bf16.msra.mxu1 %v622_v35 }
  0x37   :  { %624 = vmatprep.subr.bf16.mxu1 %v712_v6 }
  0x3a   :  { %626 = vmatpush3.bf16.msra.mxu1 %v625_v38 }
  0x3b   :  { %627 = vmatprep.subr.bf16.mxu1 %v712_v6 }
  0x3e   :  { %629 = vmatpush3.bf16.msra.mxu1 %v628_v41 }
  0x93   :  { %v72_v57 = vpop.permute.xlu1 %71  ;;  %v52_v58 = vpop.permute.xlu0 %51 }
  0x94   :  { %v58_v60 = vmul.f32 %v57_v54, %v52_v58  ;;  %v78_v9 = vmul.f32 %v77_v0, %v72_v57  ;;  %v330_v54 = vld [vmem:[%s877_s5 + $0x48] sm:$0xff]  ;;  %v333_v0 = vld [vmem:[%s877_s5 + $0x60] sm:$0xff] }
  0x95   :  { %v643_v55 = vpack.c.bf16 %v330_v54, %v329_v53 }
  0x96   :  { %v59_v1 = vadd.f32 %v421_v59, %v58_v60 }
  0x98   :  { %v82_v2 = vpop.permute.xlu1 %81  ;;  %v62_v3 = vpop.permute.xlu0 %61 }
  0x99   :  { %v68_v7 = vmul.f32 %v67_v62, %v62_v3  ;;  %v88_v13 = vmul.f32 %v87_v5, %v82_v2  ;;  %v332_v62 = vld [vmem:[%s877_s5 + $0x58] sm:$0xff]  ;;  %v335_v3 = vld [vmem:[%s877_s5 + $0x70] sm:$0xff] }
  0x9a   :  { %v646_v63 = vpack.c.bf16 %v332_v62, %v331_v61  ;;  %v652_v5 = vpack.c.bf16 %v336_v4, %v335_v3 }
  0x9b   :  { %v69_v10 = vadd.f32 %v68_v7, %v59_v1  ;;  %v334_v1 = vld [vmem:[%s877_s5 + $0x68] sm:$0xff]  ;;  %v424_v7 = vld [vmem:[%s876_s4 + $0x1] ss:$0 sm:$0xff] }
  0x9c   :  { %v649_v2 = vpack.c.bf16 %v334_v1, %v333_v0 }
  0x9d   :  { %v79_v14 = vadd.f32 %v78_v9, %v69_v10  ;;  %v92_v15 = vpop.permute.xlu1 %91  ;;  %v102_v16 = vpop.permute.xlu0 %101 }
  0x9e   :  { %v98_v17 = vmul.f32 %v97_v8, %v92_v15  ;;  %v108_v19 = vmul.f32 %v107_v11, %v102_v16 }
  0x9f   :  { %v89_v18 = vadd.f32 %v88_v13, %v79_v14 }
  0xa1   :  { %v99_v22 = vadd.f32 %v98_v17, %v89_v18 }
  0xa2   :  { %v112_v23 = vpop.permute.xlu1 %111 }
  0xa3   :  { %v109_v24 = vadd.f32 %v108_v19, %v99_v22  ;;  %v118_v25 = vmul.f32 %v117_v20, %v112_v23 }
  0xa5   :  { %v119_v28 = vadd.f32 %v118_v25, %v109_v24 }
  0xa7   :  { %v122_v27 = vpop.permute.xlu1 %121 }
  0xa8   :  { %v128_v29 = vmul.f32 %v127_v26, %v122_v27 }
  0xaa   :  { %v129_v31 = vadd.f32 %v128_v29, %v119_v28 }
  0xac   :  { %677 = vtanh.f32 %v129_v31 }
  0xb6   :  { %v678_v32 = vpop.eup %677 }
  0xb7   :  { %510 = vmatmul.mubr.f32.vlgmr.msra.gmra.mrb[0].mxu0 %v678_v32 }
  0xb8   :  { %579 = vmatprep.mubr.msk.f32.mxu0 %vm719_vm0, %v720_v30  ;;  %v321_v30 = vld [vmem:[%s877_s5] sm:$0xff] }
  0xb9   :  { %v631_v44 = vpack.c.bf16 %v322_v42, %v321_v30 }
  0xbb   :  { %632 = vmatpush3.bf16.msra.mxu0 %v631_v44 }
  0xbc   :  { %633 = vmatprep.subr.bf16.mxu0 %v712_v6 }
  0xbf   :  { %635 = vmatpush3.bf16.msra.mxu0 %v634_v46 }
  0xc0   :  { %636 = vmatprep.subr.bf16.mxu0 %v712_v6 }
  0xc3   :  { %638 = vmatpush3.bf16.msra.mxu0 %v637_v49 }
  0xc4   :  { %639 = vmatprep.subr.bf16.mxu0 %v712_v6 }
  0xc7   :  { %641 = vmatpush3.bf16.msra.mxu0 %v640_v52 }
  0xc8   :  { %642 = vmatprep.subr.bf16.mxu0 %v712_v6 }
  0xcb   :  { %644 = vmatpush3.bf16.msra.mxu0 %v643_v55 }
  0xcc   :  { %645 = vmatprep.subr.bf16.mxu0 %v712_v6 }
  0xcf   :  { %647 = vmatpush3.bf16.msra.mxu0 %v646_v63 }
  0xd0   :  { %648 = vmatprep.subr.bf16.mxu0 %v712_v6 }
  0xd3   :  { %650 = vmatpush3.bf16.msra.mxu0 %v649_v2 }
  0xd4   :  { %651 = vmatprep.subr.bf16.mxu0 %v712_v6 }
  0xd7   :  { %653 = vmatpush3.bf16.msra.mxu0 %v652_v5 }
 0x18a   :  { %v220_v57 = vpop.f32.mrb[0].mxu0 }
 0x18b   :  { %v221_v58 = vadd.f32 %v422_v56, %v220_v57  ;;  %v511_v59 = vpop.f32.mrb[1].mxu0 }
 0x18d   :  { %679 = vtanh.f32 %v221_v58 }
 0x197   :  { %v680_v60 = vpop.eup %679 }
 0x198   :  { %545 = vmatmul.mubr.f32.vlgmr.msra.gmra.mrb[0].mxu1 %v680_v60 }
 0x26b   :  { %v316_v8 = vpop.f32.mrb[0].mxu1 }
 0x26c   :  { %v317_v9 = vadd.f32 %v424_v7, %v316_v8  ;;  %v546_v10 = vpop.f32.mrb[1].mxu1 }
 0x26e   :  { %681 = vtanh.f32 %v317_v9 }
 0x278   :  { %v682_v11 = vpop.eup %681 }
 0x279   :  { %580 = vmatmul.mubr.f32.vlgmr.msra.gmra.mrb[2].mxu0 %v682_v11 }
 0x34c   :  { %v410_v13 = vpop.f32.mrb[2].mxu0 }
 0x34d   :  { %v411_v14 = vadd.f32 %v425_v12, %v410_v13  ;;  %v581_v15 = vpop.f32.mrb[3].mxu0 }
 0x34f   :  { %415 = vst.msk [vmem:[%s879_s7] sm:$0xff] %vm414_vm1, %v411_v14 }
 0x350   :  { %420 = vsyncpa [#allocation3], 1 }

</bundles_post_ra>
